<compile_context>
chip_gen: v5e
topology: v5e:2x2
jax: 0.10.0
libtpu: 0.0.40
codegen_flags: <defaults>
</compile_context>

<pallas_src>
import functools

import jax
import jax.numpy as jnp
from jax import lax
from jax.experimental import pallas as pl
from jax.experimental.pallas import tpu as pltpu


def _normalize_kernel(x_ref, o_ref, *, power):
    # x_ref / o_ref: (tile_b, D).  dim=1 of the original [B, D] tensor == lanes.
    x = x_ref[...].astype(jnp.float32)
    if power == 2:
        s = jnp.sum(x * x, axis=-1, keepdims=True)   # XLU lane reduction
        out = x * lax.rsqrt(s)                        # EUP rsqrt + VPU mul
    else:
        # Generic p (matches torch x.pow(p) semantics, incl. NaN edge cases).
        s = jnp.sum(jnp.power(x, power), axis=-1, keepdims=True)
        out = x / jnp.power(s, 1.0 / power)
    o_ref[...] = out.astype(o_ref.dtype)


def _pick_tile_b(B, D, itemsize):
    """Largest row-tile (multiple of 8, divides B) fitting a VMEM budget."""
    # in + out blocks, double-buffered -> ~4 copies of a (tile_b, D) block.
    budget = 8 << 20  # conservative; well inside scoped VMEM on v5e/v6e/v7x
    if 4 * B * D * itemsize <= budget:
        return B  # single grid step, no pipeline overhead
    cap = max(8, (budget // (4 * D * itemsize)) // 8 * 8)
    # Find the largest multiple of 8 that divides B and is <= cap.
    tile_b = cap - (cap % 8)
    while tile_b >= 8:
        if B % tile_b == 0:
            return tile_b
        tile_b -= 8
    # Fall back to any divisor of B (last resort: 1).
    for t in range(min(cap, B), 0, -1):
        if B % t == 0:
            return t
    return 1


def normalize_forward(x, power=2, *, tile_b=None):
    """L-p Normalize over dim 1 of x: [B, D] (keepdim broadcast division)."""
    assert x.ndim == 2, "kernel handles [B, D]; dim=1 is the normalized axis"
    B, D = x.shape
    itemsize = x.dtype.itemsize

    if tile_b is None:
        tile_b = _pick_tile_b(B, D, itemsize)
    assert tile_b >= 1 and B % tile_b == 0
    grid = (B // tile_b,)

    cost = pl.CostEstimate(
        flops=3 * B * D,             # square, reduce-add, scale
        transcendentals=B,           # one rsqrt per row
        bytes_accessed=2 * B * D * itemsize,
    )

    return pl.pallas_call(
        functools.partial(_normalize_kernel, power=power),
        out_shape=jax.ShapeDtypeStruct((B, D), x.dtype),
        grid=grid,
        in_specs=[pl.BlockSpec((tile_b, D), lambda i: (i, 0))],
        out_specs=pl.BlockSpec((tile_b, D), lambda i: (i, 0)),
        compiler_params=pltpu.CompilerParams(
            dimension_semantics=("parallel",),
            vmem_limit_bytes=64 << 20,
        ),
        cost_estimate=cost,
    )(x)


def reference_forward(x, power=2):
    norm = jnp.power(jnp.sum(jnp.power(x, power), axis=1, keepdims=True),
                     1.0 / power)
    return x / norm


if __name__ == "__main__":
    # Small shape consistent with the module's typical use (feature embeddings
    # normalized along dim=1): batch=8, feature dim=256 (lane-dense).
    B, D = 8, 256
    key = jax.random.PRNGKey(0)
    x = jax.random.normal(key, (B, D), dtype=jnp.float32)

    out = normalize_forward(x, power=2)
    out = jax.block_until_ready(out)

    ref = reference_forward(x, power=2)
    assert out.shape == (B, D)
    assert jnp.allclose(out, ref, atol=1e-5, rtol=1e-5), "mismatch vs reference"

    # Sanity: rows are unit-norm.
    assert jnp.allclose(jnp.linalg.norm(out, axis=1), 1.0, atol=1e-5)

    print("KERNEL_OK")
</pallas_src>

<mosaic_0001>
module attributes {stable_mosaic.version = 11 : i64} {
  func.func @_normalize_kernel(%arg0: i32, %arg1: memref<8x256xf32, #tpu.memory_space<vmem>>, %arg2: memref<8x256xf32, #tpu.memory_space<vmem>>) attributes {dimension_semantics = [#tpu.dimension_semantics<parallel>], iteration_bounds = array<i64: 1>, scalar_prefetch = 0 : i64, scratch_operands = 0 : i64, tpu.core_type = #tpu.core_type<tc>, window_params = [{transform_indices = @transform_0, window_bounds = array<i64: 8, 256>}, {transform_indices = @transform_1, window_bounds = array<i64: 8, 256>}]} {
    %c0 = arith.constant 0 : index
    %c0_0 = arith.constant 0 : index
    %0 = vector.load %arg1[%c0, %c0_0] : memref<8x256xf32, #tpu.memory_space<vmem>>, vector<8x256xf32>
    %1 = arith.mulf %0, %0 : vector<8x256xf32>
    %cst = arith.constant dense<0.000000e+00> : vector<8xf32>
    %2 = vector.multi_reduction <add>, %1, %cst [1] : vector<8x256xf32> to vector<8xf32>
    %3 = vector.shape_cast %2 : vector<8xf32> to vector<8x1xf32>
    %4 = math.rsqrt %3 : vector<8x1xf32>
    %5 = vector.broadcast %4 : vector<8x1xf32> to vector<8x256xf32>
    %6 = arith.mulf %0, %5 : vector<8x256xf32>
    %c0_1 = arith.constant 0 : index
    %c0_2 = arith.constant 0 : index
    %7 = vector.load %arg2[%c0_1, %c0_2] : memref<8x256xf32, #tpu.memory_space<vmem>>, vector<8x256xf32>
    tpu.vector_store %arg2[%c0_1, %c0_2], %6 {strides = array<i32>} : memref<8x256xf32, #tpu.memory_space<vmem>>, vector<8x256xf32>,
    return
  }
  func.func @transform_0(%arg0: i32) -> (i32, i32) {
    %c0_i32 = arith.constant 0 : i32
    %c0_i32_0 = arith.constant 0 : i32
    return %arg0, %c0_i32 : i32, i32
  }
  func.func @transform_1(%arg0: i32) -> (i32, i32) {
    %c0_i32 = arith.constant 0 : i32
    %c0_i32_0 = arith.constant 0 : i32
    return %arg0, %c0_i32 : i32, i32
  }
}

</mosaic_0001>

<bundles_post_ra>
// kernel: tpu_custom_call.1
= control target key start
LH: loop header
LB: loop body
LE: loop exit
PB: predicated region body
PF: predicated region fallthrough
CT: control target
= control target key end

     0   :  { %6 = vsyncpa [#allocation3], 0  ;;  %s135_s0 = inlined_call_operand.hbm [shape: f32[8,256], index: 0, kind: input, shape index: {}]   ;;  %s136_s1 = inlined_call_operand.hbm [shape: f32[8,256], index: 1, kind: output, shape index: {}]  }
   0x1   :  { %7 = vsyncpa [#allocation4], 0  ;;  %s13_s8 = sshll.u32 %s135_s0, 4  ;;  %s117_s9 = smov [#allocation2]   ;;  %s14_s8 = int_to_ptr.hbm [resolvable:$true] %s13_s8 }
   0x2   :  { %s15_s10 = sshll.u32 %s117_s9, 4  ;;  %s16_s10 = int_to_ptr.vmem [resolvable:$true] %s15_s10 }
   0x3   :  { %18 = dma.hbm_to_vmem [thread:$0]  %s14_s8, 256, %s16_s10, [#allocation3]  }
   0x4   :  { %113 = dma.done.wait [#allocation3], 256  }
   0x5   :  { %114 = vsyncadd [#allocation3], 4294967040  ;;  %v23_v0 = vld [vmem:[#allocation2] sm:$0xff]  ;;  %v24_v1 = vld [vmem:[#allocation2 + $0x8] sm:$0xff]  ;;  %s118_s0 = smov [#allocation5]   ;;  %s51_s14 = sshll.u32 %s136_s1, 4  ;;  %s52_s14 = int_to_ptr.hbm [resolvable:$true] %s51_s14 }
   0x6   :  { %v25_v2 = vmul.f32 %v23_v0, %v23_v0  ;;  %v26_v3 = vmul.f32 %v24_v1, %v24_v1  ;;  %s49_s11 = sshll.u32 %s118_s0, 4  ;;  %s50_s11 = int_to_ptr.vmem [resolvable:$true] %s49_s11 }
   0x8   :  { %v27_v4 = vadd.f32 %v26_v3, %v25_v2 }
   0xa   :  { %28 = vadd.xlane.f32.xlu0 %v27_v4 }
  0x7d   :  { %v29_v5 = vpop.xlane.xlu0 %28 }
  0x7e   :  { %63 = vrsqrt.f32 %v29_v5  ;;  %vm36_vm1 = vweird.f32 %v29_v5 }
  0x84   :  { %v64_v6 = vpop.eup %63 }
  0x85   :  { %v31_v7 = vmul.f32 %v64_v6, %v29_v5  ;;  %vm37_vm0 = vweird.f32 %v64_v6 }
  0x86   :  { %vm38_vm2 = vmor %vm36_vm1, %vm37_vm0 }
  0x87   :  { %v32_v8 = vmul.f32 %v64_v6, %v31_v7 }
  0x89   :  { %v33_v9 = vmul.f32 0.5, %v32_v8 }
  0x8b   :  { %v34_v10 = vsub.f32 1.5, %v33_v9 }
  0x8d   :  { %v35_v11 = vmul.f32 %v64_v6, %v34_v10 }
  0x8f   :  { %v39_v12 = vsel %vm38_vm2, %v64_v6, %v35_v11 }
  0x90   :  { %v40_v13 = vmul.f32 %v39_v12, %v23_v0  ;;  %v41_v14 = vmul.f32 %v39_v12, %v24_v1 }
  0x92   :  { %42 = vst [vmem:[#allocation5] sm:$0xff] %v40_v13 }
  0x93   :  { %43 = vst [vmem:[#allocation5 + $0x8] sm:$0xff] %v41_v14 }
  0x94   :  { %54 = dma.vmem_to_hbm [thread:$0]  %s50_s11, 256, %s52_s14, [#allocation4]  }
  0x95   :  { %115 = dma.done.wait [#allocation4], 256  }
  0x96   :  { %116 = vsyncadd [#allocation4], 4294967040 }
  0x97   :  { %59 = vsyncpa [#allocation3], 1 }
  0x98   :  { %60 = vsyncpa [#allocation4], 1 }

</bundles_post_ra>
